<compile_context>
chip_gen: v5e
topology: v5e:2x2
jax: 0.10.0
libtpu: 0.0.40
codegen_flags: <defaults>
</compile_context>

<pallas_src>
import math

import jax
import jax.numpy as jnp
from jax import lax
from jax.experimental import pallas as pl
from jax.experimental.pallas import tpu as pltpu

# VMEM accounting: input buffering is always budgeted as 3 buffers x tile,
# whether or not 3-deep pipelining is actually requested, so VMEM use is
# conservative on every generation (v5e scoped default 16 MiB, v7x physical
# 64 MiB).  12 MiB of input buffers + tiny outputs stays far below the 32 MiB
# limit we request explicitly.
VMEM_INPUT_BUDGET_BYTES = 12 * 1024 * 1024
VMEM_LIMIT_BYTES = 32 * 1024 * 1024
TARGET_BLOCKS = 8          # enough grid steps for pipeline warmup + 2 TCs
_BUFFERED = getattr(pl, "Buffered", None)   # accounting above is identical either way


def _round_up(x, m):
    return ((x + m - 1) // m) * m


def _make_gp_sumsq_kernel(rows, tk, nblocks, cols):
    """Build the per-block sum-of-squares kernel (all sizes static).

    g_ref : (rows, tk) tile of the folded gradient, native dtype.
    o_ref : (1, rows, 128) f32 partial sums, written exactly once per block.
    """
    n_chunks_full = tk // 128                       # chunks in an interior block
    valid_last = cols - (nblocks - 1) * tk          # valid cols in last block (1..tk)
    last_full = valid_last // 128                   # fully-valid chunks in last block
    tail_lanes = valid_last % 128                   # valid lanes of the partial chunk
    ragged = valid_last != tk                       # is the last block partial?
    n_acc = 4 if rows <= 16 else 2                  # independent accumulators

    def sum_sq(g_ref, full_chunks, tail):
        # Sum of squares over `full_chunks` whole 128-lane chunks plus an
        # optional masked partial chunk, accumulated in f32.
        accs = [jnp.zeros((rows, 128), jnp.float32) for _ in range(n_acc)]
        groups = full_chunks // n_acc

        if groups > 0:
            def body(g, carried):
                base = pl.multiple_of(g * (n_acc * 128), 128)
                out = []
                for a in range(n_acc):
                    x = g_ref[:, pl.ds(base + a * 128, 128)].astype(jnp.float32)
                    out.append(carried[a] + x * x)
                return tuple(out)
            accs = list(lax.fori_loop(0, groups, body, tuple(accs), unroll=2))

        # Leftover full chunks (static indices, < n_acc of them).
        for i in range(full_chunks % n_acc):
            j = groups * n_acc + i
            x = g_ref[:, j * 128:(j + 1) * 128].astype(jnp.float32)
            accs[i % n_acc] = accs[i % n_acc] + x * x

        # Partial tail chunk (only the last grid block, only if cols % 128).
        if tail:
            j = full_chunks
            lane = lax.broadcasted_iota(jnp.int32, (rows, 128), 1)
            x = g_ref[:, j * 128:(j + 1) * 128].astype(jnp.float32)
            x = jnp.where(lane < tail, x, 0.0)
            accs[0] = accs[0] + x * x

        total = accs[0]
        for a in accs[1:]:
            total = total + a
        return total

    def kernel(g_ref, o_ref):
        if nblocks == 1:
            # Single block: handles both the full and ragged case directly.
            o_ref[...] = sum_sq(g_ref, last_full, tail_lanes)[None]
        elif not ragged:
            # Every block is fully valid: one fast unmasked path.
            o_ref[...] = sum_sq(g_ref, n_chunks_full, 0)[None]
        else:
            b = pl.program_id(0)

            @pl.when(b < nblocks - 1)
            def _():
                o_ref[...] = sum_sq(g_ref, n_chunks_full, 0)[None]

            @pl.when(b == nblocks - 1)
            def _():
                o_ref[...] = sum_sq(g_ref, last_full, tail_lanes)[None]

    return kernel


def gp_norm_loss(grad_flat, *, target_blocks=TARGET_BLOCKS):
    """Pallas reduction: mean((||g_i||_2 - 1)^2) over rows of an (N, D) matrix.

    grad_flat may be f32 or bf16; accumulation is always f32; the array is
    streamed from HBM exactly once (no padding copies).
    """
    n, d = grad_flat.shape
    itemsize = jnp.dtype(grad_flat.dtype).itemsize

    # Fold batch rows into sublanes so vreg sublanes carry data when N is
    # small.  fold is the largest power of two that both divides D (so the
    # reshape is a free view -- no jnp.pad) and fills the sublane tile.
    sublanes = {4: 8, 2: 16, 1: 32}.get(itemsize, 8)
    fold_target = sublanes // math.gcd(n, sublanes)
    fold = math.gcd(d, fold_target)
    rows = n * fold
    cols = d // fold
    g2d = grad_flat.reshape(rows, cols)             # free row-major view

    # Tile sizing: big enough to amortise per-step overhead (multi-MiB blocks
    # for large D), small enough that 3 in-flight buffers stay inside the
    # VMEM budget, and small enough to give ~target_blocks grid steps so the
    # pipeline reaches steady state and v7x's 2 TCs both get work.
    rows_pad = _round_up(rows, sublanes)            # VMEM sublane padding
    tk_cap = max(128, (VMEM_INPUT_BUDGET_BYTES // (3 * rows_pad * itemsize)) // 128 * 128)
    tk_steps = _round_up(pl.cdiv(cols, target_blocks), 128)
    tk = max(128, min(tk_cap, tk_steps, _round_up(cols, 128)))
    nblocks = pl.cdiv(cols, tk)

    kernel = _make_gp_sumsq_kernel(rows, tk, nblocks, cols)

    in_kwargs = {}
    if _BUFFERED is not None and nblocks >= 4:
        # 3-deep input pipelining; VMEM accounting above already assumes it.
        in_kwargs["pipeline_mode"] = _BUFFERED(3)
    in_spec = pl.BlockSpec((rows, tk), lambda b: (0, b), **in_kwargs)
    out_spec = pl.BlockSpec((1, rows, 128), lambda b: (b, 0, 0))

    cost = pl.CostEstimate(
        flops=2 * rows * cols,
        transcendentals=0,
        bytes_accessed=rows * cols * itemsize + nblocks * rows * 128 * 4,
    )

    partial = pl.pallas_call(
        kernel,
        out_shape=jax.ShapeDtypeStruct((nblocks, rows, 128), jnp.float32),
        grid_spec=pltpu.PrefetchScalarGridSpec(
            num_scalar_prefetch=0,
            grid=(nblocks,),
            in_specs=[in_spec],
            out_specs=out_spec,
        ),
        compiler_params=pltpu.CompilerParams(
            dimension_semantics=("parallel",),
            vmem_limit_bytes=VMEM_LIMIT_BYTES,
        ),
        cost_estimate=cost,
    )(g2d)

    # O(nblocks * N * 128) finalize outside the kernel: combine blocks + lanes,
    # un-fold the batch, sqrt, (norm - 1)^2, mean.
    sumsq_rows = jnp.sum(partial, axis=(0, 2))              # (rows,)
    sumsq = jnp.sum(sumsq_rows.reshape(n, fold), axis=1)    # (N,)
    norm = jnp.sqrt(sumsq)
    return jnp.mean((norm - 1.0) ** 2)


def gradient_penalty_loss(critic_fn, interp):
    """JAX/Pallas equivalent of GradientPenaltyLoss.forward.

    torch.autograd.grad(interp_crit, interp, grad_outputs=ones) is reproduced
    with jax.vjp + an all-ones cotangent (the get_grad_outputs buffer).  The
    gradient is handed to the kernel in its native dtype (no f32 pre-cast).
    """
    interp_crit, vjp_fn = jax.vjp(critic_fn, interp)
    grad_outputs = jnp.ones_like(interp_crit)         # get_grad_outputs(...)
    (grad_interp,) = vjp_fn(grad_outputs)
    n = grad_interp.shape[0]
    return gp_norm_loss(grad_interp.reshape(n, -1))   # grad_interp.view(N, -1)


if __name__ == "__main__":
    # 1) Full GradientPenaltyLoss path: critic VJP -> Pallas norm loss.
    N, C, H, W = 2, 4, 16, 16
    D = C * H * W

    key = jax.random.PRNGKey(0)
    k_x, k_w, k_g, k_o = jax.random.split(key, 4)
    interp = jax.random.normal(k_x, (N, C, H, W), dtype=jnp.float32)

    # Deterministic stand-in critic (in PyTorch interp_crit comes from an
    # external discriminator): flatten -> tanh -> linear.
    # TODO(synk): the real ESRGAN discriminator network is external to this module.
    w_crit = jax.random.normal(k_w, (D, 1), dtype=jnp.float32) * 0.02

    def critic_fn(x):
        return jnp.tanh(x.reshape(x.shape[0], -1)) @ w_crit   # (N, 1)

    loss = jax.block_until_ready(gradient_penalty_loss(critic_fn, interp))

    _, vjp_fn = jax.vjp(critic_fn, interp)
    (g_ref,) = vjp_fn(jnp.ones((N, 1), jnp.float32))
    ref = jnp.mean((jnp.linalg.norm(g_ref.reshape(N, -1), axis=1) - 1.0) ** 2)
    assert jnp.allclose(loss, ref, rtol=1e-5, atol=1e-6), (loss, ref)

    # 2) Multi-block, non-divisible-D path (exercises in-kernel tail masking,
    #    the fori_loop/multi-accumulator body and 3-deep buffering).
    g_big = jax.random.normal(k_g, (4, 50000), dtype=jnp.float32) * 0.01
    loss_big = jax.block_until_ready(gp_norm_loss(g_big))
    ref_big = jnp.mean((jnp.linalg.norm(g_big, axis=1) - 1.0) ** 2)
    assert jnp.allclose(loss_big, ref_big, rtol=1e-4, atol=1e-5), (loss_big, ref_big)

    # 3) Native-bf16 gradient path (kernel streams bf16, accumulates in f32).
    g_bf16 = g_big.astype(jnp.bfloat16)
    loss_bf = jax.block_until_ready(gp_norm_loss(g_bf16))
    ref_bf = jnp.mean(
        (jnp.linalg.norm(g_bf16.astype(jnp.float32), axis=1) - 1.0) ** 2)
    assert jnp.allclose(loss_bf, ref_bf, rtol=1e-3, atol=1e-3), (loss_bf, ref_bf)

    # 4) Odd feature dim: fold=1, ragged last block AND partial 128-lane chunk.
    g_odd = jax.random.normal(k_o, (2, 12345), dtype=jnp.float32) * 0.01
    loss_odd = jax.block_until_ready(gp_norm_loss(g_odd))
    ref_odd = jnp.mean((jnp.linalg.norm(g_odd, axis=1) - 1.0) ** 2)
    assert jnp.allclose(loss_odd, ref_odd, rtol=1e-4, atol=1e-5), (loss_odd, ref_odd)

    print("KERNEL_OK")
</pallas_src>

<mosaic_0001>
module attributes {stable_mosaic.version = 11 : i64} {
  func.func @kernel(%arg0: i32, %arg1: memref<8x128xf32, #tpu.memory_space<vmem>>, %arg2: memref<1x8x128xf32, #tpu.memory_space<vmem>>) attributes {dimension_semantics = [#tpu.dimension_semantics<parallel>], iteration_bounds = array<i64: 2>, scalar_prefetch = 0 : i64, scratch_operands = 0 : i64, tpu.core_type = #tpu.core_type<tc>, window_params = [{transform_indices = @transform_0, window_bounds = array<i64: 8, 128>}, {transform_indices = @transform_1, window_bounds = array<i64: 1, 8, 128>}]} {
    %cst = arith.constant 0.000000e+00 : f32
    %0 = vector.broadcast %cst : f32 to vector<8x128xf32>
    %cst_0 = arith.constant 0.000000e+00 : f32
    %1 = vector.broadcast %cst_0 : f32 to vector<8x128xf32>
    %cst_1 = arith.constant 0.000000e+00 : f32
    %2 = vector.broadcast %cst_1 : f32 to vector<8x128xf32>
    %cst_2 = arith.constant 0.000000e+00 : f32
    %3 = vector.broadcast %cst_2 : f32 to vector<8x128xf32>
    %c0 = arith.constant 0 : index
    %c0_3 = arith.constant 0 : index
    %4 = vector.load %arg1[%c0, %c0_3] : memref<8x128xf32, #tpu.memory_space<vmem>>, vector<8x128xf32>
    %5 = arith.mulf %4, %4 : vector<8x128xf32>
    %6 = arith.addf %0, %5 : vector<8x128xf32>
    %7 = arith.addf %6, %1 : vector<8x128xf32>
    %8 = arith.addf %7, %2 : vector<8x128xf32>
    %9 = arith.addf %8, %3 : vector<8x128xf32>
    %10 = vector.shape_cast %9 : vector<8x128xf32> to vector<1x8x128xf32>
    %c0_4 = arith.constant 0 : index
    %c0_5 = arith.constant 0 : index
    %c0_6 = arith.constant 0 : index
    %11 = vector.load %arg2[%c0_4, %c0_5, %c0_6] : memref<1x8x128xf32, #tpu.memory_space<vmem>>, vector<1x8x128xf32>
    tpu.vector_store %arg2[%c0_4, %c0_5, %c0_6], %10 {strides = array<i32>} : memref<1x8x128xf32, #tpu.memory_space<vmem>>, vector<1x8x128xf32>,
    return
  }
  func.func @transform_0(%arg0: i32) -> (i32, i32) {
    %c0_i32 = arith.constant 0 : i32
    %c0_i32_0 = arith.constant 0 : i32
    return %c0_i32, %arg0 : i32, i32
  }
  func.func @transform_1(%arg0: i32) -> (i32, i32, i32) {
    %c0_i32 = arith.constant 0 : i32
    %c0_i32_0 = arith.constant 0 : i32
    %c0_i32_1 = arith.constant 0 : i32
    return %arg0, %c0_i32, %c0_i32_0 : i32, i32, i32
  }
}

</mosaic_0001>

<bundles_post_ra>
// kernel: tpu_custom_call.1
= control target key start
LH: loop header
LB: loop body
LE: loop exit
PB: predicated region body
PF: predicated region fallthrough
CT: control target
= control target key end

     0   :  { %6 = vsyncpa [#allocation3], 0  ;;  %s520_s0 = inlined_call_operand.hbm [shape: f32[8,256], index: 0, kind: input, shape index: {}]   ;;  %s521_s1 = inlined_call_operand.hbm [shape: f32[2,8,128], index: 1, kind: output, shape index: {}]  }
   0x1   :  { %8 = vsyncpa [#allocation3 + $0x1], 0 }
   0x2   :  { %9 = vsyncpa [#allocation4], 0 }
   0x3   :  { %11 = vsyncpa [#allocation4 + $0x1], 0  ;;  %s393_s6 = smov 0   ;;  %s395_s7 = smov 0  }
   0x4   :  { %s397_s8 = smov 0   ;;  %s399_s9 = smov 0  }
   0x5 LB: > { %s414_s10 = sadd.s32 4294967295, %s381_s9   ;;  %s227_s11 = sadd.s32 4294967294, %s381_s9   ;;  %s381_s9 = sphi %s399_s9, %s531_s9   ;;  %s377_s8 = sphi %s397_s8, %s530_s8   ;;  %s373_s7 = sphi %s395_s7, %s529_s7   ;;  %s369_s6 = sphi %s393_s6, %s528_s6  }
   0x6   : > { %s418_s12 = sadd.s32 1, %s381_s9   ;;  %s24_s13 = sadd.s32 1, %s377_s8 }
   0x7   : > { %s21_s14 = ssub.s32 %s381_s9, %s418_s12  ;;  %p31_p0 = scmp.ne.s32.totalorder %s377_s8, %s373_s7 }
   0x8   : > { %p22_p1 = scmp.eq.s32.totalorder %s21_s14, 0  ;;  %p32_p2 = scmp.eq.s32.totalorder %s381_s9, 0 }
   0x9   : > { %p37_p3 = scmp.ne.s32.totalorder %s373_s7, %s369_s6  ;;  %p38_p4 = scmp.eq.s32.totalorder %s414_s10, 0 }
   0xa   : > { %s430_s15 = scalar_select %p22_p1, %s377_s8, %s24_s13  }
   0xb   : > { %p432_p5 = por %p32_p2, %p31_p0  ;;  %p436_p6 = por %p38_p4, %p37_p3 }
   0xc   : > { %p61_p7 = scmp.eq.s32.totalorder %s414_s10, 1  ;;  %p67_p8 = scmp.eq.s32.totalorder %s227_s11, 1 }
   0xd   : > { %p251_p10 = scmp.lt.s32.totalorder %s381_s9, 2  ;;  %s87_s20 = sand.u32 1, %s377_s8  }
   0xe   : > { %p443_p11 = por %p61_p7, %p31_p0  ;;  %p447_p12 = por %p67_p8, %p37_p3 }
   0xf   : > { %s231_s21 = sshll.u32 %s381_s9, 3  ;;  %s230_s22 = sshll.u32 %s87_s20, 3 }
  0x10   : > { %s95_s25 = scalar_lea.hbm %s520_s0, %s231_s21  ;;  %s91_s27 = scalar_lea.vmem [#allocation2], %s230_s22 }
  0x11   : > { %s97_s26 = sshll.u32 %s95_s25, 4  ;;  %s99_s28 = sshll.u32 %s91_s27, 4  ;;  %s98_s26 = int_to_ptr.hbm [resolvable:$true] %s97_s26  ;;  %s100_s28 = int_to_ptr.vmem [resolvable:$true] %s99_s28 }
  0x12   : > { %p458_p13 = pnand %p251_p10, %p432_p5  ;;  %p232_p0 = scmp.ge.s32.totalorder %s381_s9, 1 }
  0x13   : > { %p104_p1 = scmp.lt.s32.totalorder %s381_s9, 3  ;;  %s88_s30 = scalar_lea.sflag [#allocation3], %s87_s20 }
  0x14   : > { %s285_s2 = sshra.s32 %s98_s26, 4  ;;  %p289_p3 = pneg %p458_p13  ;;  %s286_s2 = int_to_ptr.hbm [resolvable:$true] %s285_s2 }
  0x15   : > { %s287_s3 = scalar_lea.hbm %s286_s2, 8  ;;  %s292_s11 = scalar_lea.hbm %s520_s0, 16 }
  0x16   : > { %p288_p2 = scmp.ne.s32.totalorder %s286_s2, %s287_s3  ;;  %p293_p5 = scmp.lt.s32.totalorder %s286_s2, %s520_s0 }
  0x17   : > { %p294_p8 = scmp.lt.s32.totalorder %s292_s11, %s287_s3 }
  0x18   : > { %p290_p4 = pnand %p289_p3, %p288_p2 }
  0x19   : > { %p295_p10 = por %p294_p8, %p293_p5 }
  0x1a   : > { %p291_p7 = pneg %p290_p4 }
  0x1c   : > { %p296_p9 = pnand %p295_p10, %p291_p7 }
  0x1e   : > { %299 = shalt.err (!%p296_p9)
}
  0x1f   : > { %246 = dma.hbm_to_vmem [thread:$0]  (!%p458_p13), %s98_s26, 128, %s100_s28, %s88_s30  }
  0x20   : > { %p105_p2 = pnand %p232_p0, %p104_p1 }
  0x21   : > { %s479_s16 = sand.u32 (!%p105_p2), 1, %s373_s7  }
  0x22   : > { %108 = sbr.rel (%p105_p2) target bundleno = 55 (0x37), region = 24  ;;  %s233_s20 = sshll.u32 (!%p105_p2), %s479_s16, 3 }
  0x23   : > { %s111_s21 = scalar_lea.sflag (!%p105_p2), [#allocation3], %s479_s16  ;;  %s114_s22 = scalar_lea.vmem (!%p105_p2), [#allocation2], %s233_s20 }
  0x27   : > { %360 = dma.done.wait (%p436_p6), %s111_s21, 128  }
  0x28   : > { %362 = vsyncadd (%p436_p6), %s111_s21, 4294967168  ;;  %s236_s23 = sshll.u32 %s414_s10, 3  ;;  %s133_s27 = scalar_lea.vmem [#allocation5], %s233_s20  ;;  %v134_v0 = vld [vmem:[%s114_s22] sm:$0xff] }
  0x29   : > { %s152_s26 = scalar_lea.hbm %s521_s1, %s236_s23  ;;  %s154_s28 = sshll.u32 %s133_s27, 4  ;;  %v135_v1 = vmul.f32 %v134_v0, %v134_v0  ;;  %s155_s28 = int_to_ptr.vmem [resolvable:$true] %s154_s28 }
  0x2a   : > { %s156_s29 = sshll.u32 %s152_s26, 4  ;;  %s142_s30 = scalar_lea.sflag [#allocation4], %s479_s16  ;;  %s157_s29 = int_to_ptr.hbm [resolvable:$true] %s156_s29 }
  0x2b   : > { %140 = vst [vmem:[%s133_s27] sm:$0xff] %v135_v1  ;;  %s329_s2 = sshra.s32 %s157_s29, 4  ;;  %s335_s4 = scalar_lea.hbm %s521_s1, 16  ;;  %s330_s2 = int_to_ptr.hbm [resolvable:$true] %s329_s2 }
  0x2c   : > { %s331_s17 = scalar_lea.hbm %s330_s2, 8  ;;  %p336_p0 = scmp.lt.s32.totalorder %s330_s2, %s521_s1 }
  0x2d   : > { %p332_p6 = scmp.ne.s32.totalorder %s330_s2, %s331_s17  ;;  %p337_p1 = scmp.lt.s32.totalorder %s335_s4, %s331_s17 }
  0x2f   : > { %p333_p9 = pnand %p332_p6, %p443_p11  ;;  %p338_p3 = por %p337_p1, %p336_p0 }
  0x31   : > { %p334_p13 = pneg %p333_p9 }
  0x33   : > { %p339_p4 = pnand %p338_p3, %p334_p13 }
  0x35   : > { %342 = shalt.err (!%p339_p4)
}
  0x36   : > { %241 = dma.vmem_to_hbm [thread:$0]  (%p443_p11), %s155_s28, 128, %s157_s29, %s142_s30  }
  0x37 PF: > { %s168_s13 = sand.u32 1, %s369_s6   ;;  %p527_p7 = scmp.ge.s32.totalorder %s381_s9, 2 }
  0x38   : > { %s169_s14 = scalar_lea.sflag [#allocation4], %s168_s13 }
  0x39   : > { %p248_p5 = pnand %p527_p7, %p447_p12 }
  0x3b   : > { %p249_p8 = pneg %p248_p5 }
  0x3d   : > { %364 = dma.done.wait (%p249_p8), %s169_s14, 128  }
  0x3e   : > { %366 = vsyncadd (%p249_p8), %s169_s14, 4294967168  ;;  %p14_p10 = scmp.ge.s32.totalorder %s418_s12, 4   ;;  %s528_s6 = smov %s373_s7 }
  0x3f   : > { %s529_s7 = smov %s377_s8  ;;  %s530_s8 = smov %s430_s15 }
  0x40   : > { %s531_s9 = smov %s418_s12  ;;  %16 = sbr.rel (!%p14_p10) target bundleno = 5 (0x5), region = 69 }
  0x45   :  { %175 = vsyncpa [#allocation3], 1 }
  0x46   :  { %177 = vsyncpa [#allocation3 + $0x1], 1 }
  0x47   :  { %178 = vsyncpa [#allocation4], 1 }
  0x48   :  { %180 = vsyncpa [#allocation4 + $0x1], 1 }

</bundles_post_ra>
